<compile_context>
chip_gen: v6e
topology: v6e:2x2x1
jax: 0.10.0
libtpu: 0.0.40
codegen_flags: <defaults>
</compile_context>

<pallas_src>
import jax
import jax.numpy as jnp
from jax import lax
from jax.experimental import pallas as pl
from jax.experimental.pallas import tpu as pltpu


def _round_up(a, m):
    return (a + m - 1) // m * m


def _pad_gate_cols(w, n_groups, h, h_pad):
    """Zero-pad the last dim of w from n_groups*h to n_groups*h_pad, per gate group."""
    lead = w.shape[:-1]
    w = w.reshape(lead + (n_groups, h))
    pad = [(0, 0)] * (len(lead) + 1) + [(0, h_pad - h)]
    return jnp.pad(w, pad).reshape(lead + (n_groups * h_pad,))


def _vmem_tile_bytes(shape, itemsize):
    """Rough VMEM footprint of a 2-D tile after (8, 128) layout padding."""
    rows = _round_up(shape[0], 8)
    cols = _round_up(shape[-1], 128)
    return rows * cols * itemsize


def _decoder_kernel(z_ref, x_ref, wfc_ref, bfc_ref, wihx_ref, wihz_ref, b_ref,
                    whh_ref, wout_ref, bout_ref, out_ref,
                    gx_scr, hall_scr, h_scr, c_scr, gz_scr):
    """One grid step = one chunk of Tc timesteps.

    Prologue (chunk 0 only): h0/c0 = split(tanh(z @ w_fc + b_fc)) and the
    loop-invariant z-gate term z @ w_ih_z + b, both kept in persistent VMEM scratch.
    Per chunk: one batched x projection, a short serial LSTM loop (only h @ w_hh is
    recurrent), one batched lane-dense output projection.
    """
    B_pad = z_ref.shape[0]
    H_pad = whh_ref.shape[0]
    Tc = x_ref.shape[0] // B_pad

    @pl.when(pl.program_id(0) == 0)
    def _init():
        hc = jnp.tanh(
            jnp.dot(z_ref[...], wfc_ref[...], preferred_element_type=jnp.float32)
            + bfc_ref[...])
        h_scr[...] = hc[:, :H_pad]          # lane-aligned split (H_pad % 128 == 0)
        c_scr[...] = hc[:, H_pad:]
        gz_scr[...] = (
            jnp.dot(z_ref[...], wihz_ref[...], preferred_element_type=jnp.float32)
            + b_ref[...])

    # Time-parallel x projection for this chunk: (Tc*B, Din) x (Din, 4H) on the MXU.
    gx_scr[...] = jnp.dot(x_ref[...], wihx_ref[...],
                          preferred_element_type=jnp.float32)
    gz = gz_scr[...]                                            # (B_pad, 4*H_pad)

    def step(t, carry):
        h, c = carry
        row = pl.multiple_of(t * B_pad, 8)                      # B_pad % 8 == 0
        gates = (gx_scr[pl.ds(row, B_pad), :] + gz
                 + jnp.dot(h.astype(whh_ref.dtype), whh_ref[...],
                           preferred_element_type=jnp.float32))
        # Lane-aligned gate slices (H_pad is a multiple of 128).
        i = jax.nn.sigmoid(gates[:, 0 * H_pad:1 * H_pad])
        f = jax.nn.sigmoid(gates[:, 1 * H_pad:2 * H_pad])
        g = jnp.tanh(gates[:, 2 * H_pad:3 * H_pad])
        o = jax.nn.sigmoid(gates[:, 3 * H_pad:4 * H_pad])
        c_new = f * c + i * g
        h_new = o * jnp.tanh(c_new)
        hall_scr[pl.ds(row, B_pad), :] = h_new
        return (h_new, c_new)

    # Bounded unroll: only Tc (chunk length) steps are unrolled, never the full T.
    h_fin, c_fin = lax.fori_loop(0, Tc, step, (h_scr[...], c_scr[...]), unroll=True)
    h_scr[...] = h_fin
    c_scr[...] = c_fin

    # One batched, lane-dense output projection per chunk.
    out_ref[...] = (
        jnp.dot(hall_scr[...].astype(wout_ref.dtype), wout_ref[...],
                preferred_element_type=jnp.float32)
        + bout_ref[...]).astype(out_ref.dtype)


def decoder_forward(params, x, z, *, t_chunk=4):
    """x: (B, T, input_size), z: (B, z_size) -> (B, T, out_size)."""
    B, T, input_size = x.shape
    z_size = z.shape[1]
    H = params["w_hh"].shape[0]
    O = params["w_out"].shape[1]

    if not t_chunk or T % t_chunk != 0:
        t_chunk = T
    Tc = t_chunk

    # ----- layout padding (per perf review): H,O -> 128-multiple, B -> 8-multiple ----
    H_pad = _round_up(H, 128)
    O_pad = _round_up(O, 128)
    B_pad = _round_up(B, 8)

    bf16 = jnp.bfloat16
    w_fc = _pad_gate_cols(params["w_fc"], 2, H, H_pad).astype(bf16)
    b_fc = _pad_gate_cols(params["b_fc"], 2, H, H_pad)                    # f32 bias
    w_ih_x = _pad_gate_cols(params["w_ih"][:input_size], 4, H, H_pad).astype(bf16)
    w_ih_z = _pad_gate_cols(params["w_ih"][input_size:], 4, H, H_pad).astype(bf16)
    b_lstm = _pad_gate_cols(params["b"], 4, H, H_pad)                     # f32 bias
    w_hh = _pad_gate_cols(jnp.pad(params["w_hh"], ((0, H_pad - H), (0, 0))),
                          4, H, H_pad).astype(bf16)
    w_out = jnp.pad(params["w_out"], ((0, H_pad - H), (0, O_pad - O))).astype(bf16)
    b_out = jnp.pad(params["b_out"], ((0, 0), (0, O_pad - O)))            # f32 bias

    z_p = jnp.pad(z, ((0, B_pad - B), (0, 0))).astype(bf16)
    # Time-major rows (T*B_pad, Din); z is NOT broadcast/concatenated in HBM.
    x_p = jnp.pad(x, ((0, B_pad - B), (0, 0), (0, 0)))
    x2d = jnp.transpose(x_p, (1, 0, 2)).reshape(T * B_pad, input_size).astype(bf16)

    n_chunks = T // Tc

    # ----- VMEM budget (lane-padded tiles, double-buffered blocks + scratch) --------
    blocks = [                                    # (shape, itemsize)
        ((B_pad, z_size), 2), ((Tc * B_pad, input_size), 2),
        ((z_size, 2 * H_pad), 2), ((1, 2 * H_pad), 4),
        ((input_size, 4 * H_pad), 2), ((z_size, 4 * H_pad), 2),
        ((1, 4 * H_pad), 4), ((H_pad, 4 * H_pad), 2),
        ((H_pad, O_pad), 2), ((1, O_pad), 4),
        ((Tc * B_pad, O_pad), 4),
    ]
    scratch = [((Tc * B_pad, 4 * H_pad), 4), ((Tc * B_pad, H_pad), 4),
               ((B_pad, H_pad), 4), ((B_pad, H_pad), 4), ((B_pad, 4 * H_pad), 4)]
    vmem_bytes = (sum(2 * _vmem_tile_bytes(s, b) for s, b in blocks)
                  + sum(_vmem_tile_bytes(s, b) for s, b in scratch))
    vmem_limit = int(max(16 << 20, min(64 << 20, 2 * vmem_bytes + (4 << 20))))

    grid_spec = pltpu.PrefetchScalarGridSpec(
        num_scalar_prefetch=0,
        grid=(n_chunks,),
        in_specs=[
            pl.BlockSpec((B_pad, z_size), lambda t: (0, 0)),              # z
            pl.BlockSpec((Tc * B_pad, input_size), lambda t: (t, 0)),     # x chunk
            pl.BlockSpec((z_size, 2 * H_pad), lambda t: (0, 0)),          # w_fc
            pl.BlockSpec((1, 2 * H_pad), lambda t: (0, 0)),               # b_fc
            pl.BlockSpec((input_size, 4 * H_pad), lambda t: (0, 0)),      # w_ih (x part)
            pl.BlockSpec((z_size, 4 * H_pad), lambda t: (0, 0)),          # w_ih (z part)
            pl.BlockSpec((1, 4 * H_pad), lambda t: (0, 0)),               # lstm bias
            pl.BlockSpec((H_pad, 4 * H_pad), lambda t: (0, 0)),           # w_hh
            pl.BlockSpec((H_pad, O_pad), lambda t: (0, 0)),               # w_out
            pl.BlockSpec((1, O_pad), lambda t: (0, 0)),                   # b_out
        ],
        out_specs=pl.BlockSpec((Tc * B_pad, O_pad), lambda t: (t, 0)),
        scratch_shapes=[
            pltpu.VMEM((Tc * B_pad, 4 * H_pad), jnp.float32),   # per-chunk x-gates
            pltpu.VMEM((Tc * B_pad, H_pad), jnp.float32),       # per-chunk hidden slab
            pltpu.VMEM((B_pad, H_pad), jnp.float32),            # carried h
            pltpu.VMEM((B_pad, H_pad), jnp.float32),            # carried c
            pltpu.VMEM((B_pad, 4 * H_pad), jnp.float32),        # z-gates + bias
        ],
    )

    out2d = pl.pallas_call(
        _decoder_kernel,
        out_shape=jax.ShapeDtypeStruct((T * B_pad, O_pad), jnp.float32),
        grid_spec=grid_spec,
        compiler_params=pltpu.CompilerParams(
            # Time-chunk axis carries (h, c) -> must be sequential.
            dimension_semantics=("arbitrary",),
            vmem_limit_bytes=vmem_limit),
    )(z_p, x2d, w_fc, b_fc, w_ih_x, w_ih_z, b_lstm, w_hh, w_out, b_out)

    # (T*B_pad, O_pad) -> (B, T, O); padded batch/out entries sliced off.
    return jnp.transpose(out2d.reshape(T, B_pad, O_pad)[:, :B, :O], (1, 0, 2))


def ref_decoder(params, x, z):
    """Pure-JAX f32 reference (same math as the PyTorch module)."""
    H = params["w_hh"].shape[0]
    hc = jnp.tanh(z @ params["w_fc"] + params["b_fc"][0])
    h0, c0 = hc[:, :H], hc[:, H:]
    B, T, _ = x.shape
    z_exp = jnp.broadcast_to(z[:, None, :], (B, T, z.shape[1]))
    xz_tm = jnp.transpose(jnp.concatenate([x, z_exp], axis=2), (1, 0, 2))

    def step(carry, x_t):
        h, c = carry
        gates = x_t @ params["w_ih"] + h @ params["w_hh"] + params["b"][0]
        i = jax.nn.sigmoid(gates[:, 0 * H:1 * H])
        f = jax.nn.sigmoid(gates[:, 1 * H:2 * H])
        g = jnp.tanh(gates[:, 2 * H:3 * H])
        o = jax.nn.sigmoid(gates[:, 3 * H:4 * H])
        c = f * c + i * g
        h = o * jnp.tanh(c)
        out = h @ params["w_out"] + params["b_out"][0]
        return (h, c), out

    (_, _), outs = lax.scan(step, (h0, c0), xz_tm)
    return jnp.transpose(outs, (1, 0, 2))


def init_params(key, input_size, h_size, z_size, out_size):
    D = input_size + z_size
    ks = jax.random.split(key, 7)

    def u(k, shape, fan_in):
        bound = 1.0 / jnp.sqrt(jnp.float32(fan_in))
        return jax.random.uniform(k, shape, jnp.float32, -bound, bound)

    return dict(
        w_fc=u(ks[0], (z_size, 2 * h_size), z_size),
        b_fc=u(ks[1], (1, 2 * h_size), z_size),
        w_ih=u(ks[2], (D, 4 * h_size), h_size),
        w_hh=u(ks[3], (h_size, 4 * h_size), h_size),
        b=u(ks[4], (1, 4 * h_size), h_size),             # b_ih + b_hh combined
        w_out=u(ks[5], (h_size, out_size), h_size),
        b_out=u(ks[6], (1, out_size), h_size),
    )


if __name__ == "__main__":
    input_size, h_size, z_size, out_size = 5, 32, 16, 8
    B, T = 2, 8

    key = jax.random.PRNGKey(0)
    kx, kz, kp = jax.random.split(key, 3)
    x = jax.random.normal(kx, (B, T, input_size), jnp.float32)
    z = jax.random.normal(kz, (B, z_size), jnp.float32)
    params = init_params(kp, input_size, h_size, z_size, out_size)

    fwd = jax.jit(lambda p, xx, zz: decoder_forward(p, xx, zz, t_chunk=4))
    out = jax.block_until_ready(fwd(params, x, z))
    ref = jax.block_until_ready(ref_decoder(params, x, z))

    assert out.shape == (B, T, out_size), out.shape
    # bf16 MXU inputs (f32 accumulate) per the perf review -> mixed-precision tolerance
    # vs. the strict f32 reference.
    err = float(jnp.max(jnp.abs(out - ref)))
    if err > 4e-2:
        raise AssertionError(f"mismatch vs reference: max abs err {err}")
    print("KERNEL_OK")
</pallas_src>

<mosaic_0001>
module attributes {stable_mosaic.version = 11 : i64} {
  func.func @_decoder_kernel(%arg0: i32, %arg1: memref<8x16xbf16, #tpu.memory_space<vmem>>, %arg2: memref<32x5xbf16, #tpu.memory_space<vmem>>, %arg3: memref<16x256xbf16, #tpu.memory_space<vmem>>, %arg4: memref<1x256xf32, #tpu.memory_space<vmem>>, %arg5: memref<5x512xbf16, #tpu.memory_space<vmem>>, %arg6: memref<16x512xbf16, #tpu.memory_space<vmem>>, %arg7: memref<1x512xf32, #tpu.memory_space<vmem>>, %arg8: memref<128x512xbf16, #tpu.memory_space<vmem>>, %arg9: memref<128x128xbf16, #tpu.memory_space<vmem>>, %arg10: memref<1x128xf32, #tpu.memory_space<vmem>>, %arg11: memref<32x128xf32, #tpu.memory_space<vmem>>, %arg12: memref<32x512xf32, #tpu.memory_space<vmem>>, %arg13: memref<32x128xf32, #tpu.memory_space<vmem>>, %arg14: memref<8x128xf32, #tpu.memory_space<vmem>>, %arg15: memref<8x128xf32, #tpu.memory_space<vmem>>, %arg16: memref<8x512xf32, #tpu.memory_space<vmem>>) attributes {dimension_semantics = [#tpu.dimension_semantics<arbitrary>], iteration_bounds = array<i64: 2>, scalar_prefetch = 0 : i64, scratch_operands = 5 : i64, tpu.core_type = #tpu.core_type<tc>, window_params = [{pipeline_mode = #tpu.pipeline_mode<synchronous>, transform_indices = @transform_0, window_bounds = array<i64: 8, 16>}, {transform_indices = @transform_1, window_bounds = array<i64: 32, 5>}, {pipeline_mode = #tpu.pipeline_mode<synchronous>, transform_indices = @transform_2, window_bounds = array<i64: 16, 256>}, {pipeline_mode = #tpu.pipeline_mode<synchronous>, transform_indices = @transform_3, window_bounds = array<i64: 1, 256>}, {pipeline_mode = #tpu.pipeline_mode<synchronous>, transform_indices = @transform_4, window_bounds = array<i64: 5, 512>}, {pipeline_mode = #tpu.pipeline_mode<synchronous>, transform_indices = @transform_5, window_bounds = array<i64: 16, 512>}, {pipeline_mode = #tpu.pipeline_mode<synchronous>, transform_indices = @transform_6, window_bounds = array<i64: 1, 512>}, {pipeline_mode = #tpu.pipeline_mode<synchronous>, transform_indices = @transform_7, window_bounds = array<i64: 128, 512>}, {pipeline_mode = #tpu.pipeline_mode<synchronous>, transform_indices = @transform_8, window_bounds = array<i64: 128, 128>}, {pipeline_mode = #tpu.pipeline_mode<synchronous>, transform_indices = @transform_9, window_bounds = array<i64: 1, 128>}, {transform_indices = @transform_10, window_bounds = array<i64: 32, 128>}]} {
    %c0_i32 = arith.constant 0 : i32
    %0 = arith.cmpi eq, %arg0, %c0_i32 : i32
    %1 = arith.extui %0 : i1 to i32
    %c0_i32_0 = arith.constant 0 : i32
    %2 = arith.cmpi ne, %1, %c0_i32_0 : i32
    scf.if %2 {
      %c0_61 = arith.constant 0 : index
      %c0_62 = arith.constant 0 : index
      %164 = vector.load %arg1[%c0_61, %c0_62] : memref<8x16xbf16, #tpu.memory_space<vmem>>, vector<8x16xbf16>
      %c0_63 = arith.constant 0 : index
      %c0_64 = arith.constant 0 : index
      %165 = vector.load %arg3[%c0_63, %c0_64] : memref<16x256xbf16, #tpu.memory_space<vmem>>, vector<16x256xbf16>
      %cst_65 = arith.constant dense<0.000000e+00> : vector<8x256xf32>
      %166 = tpu.matmul %164, %165, %cst_65 {dimension_numbers = #tpu.dot_dimension_numbers<[1], [0], [0], [1], [0, 0, 1, 1], [], []>} : vector<8x16xbf16>, vector<16x256xbf16>, vector<8x256xf32> -> vector<8x256xf32>
      %c0_66 = arith.constant 0 : index
      %c0_67 = arith.constant 0 : index
      %167 = vector.load %arg4[%c0_66, %c0_67] : memref<1x256xf32, #tpu.memory_space<vmem>>, vector<1x256xf32>
      %168 = vector.broadcast %167 : vector<1x256xf32> to vector<8x256xf32>
      %169 = arith.addf %166, %168 : vector<8x256xf32>
      %170 = math.tanh %169 : vector<8x256xf32>
      %171 = vector.extract_strided_slice %170 {offsets = [0, 0], sizes = [8, 128], strides = [1, 1]} : vector<8x256xf32> to vector<8x128xf32>
      %c0_68 = arith.constant 0 : index
      %c0_69 = arith.constant 0 : index
      %172 = vector.load %arg14[%c0_68, %c0_69] : memref<8x128xf32, #tpu.memory_space<vmem>>, vector<8x128xf32>
      tpu.vector_store %arg14[%c0_68, %c0_69], %171 {strides = array<i32>} : memref<8x128xf32, #tpu.memory_space<vmem>>, vector<8x128xf32>,
      %173 = vector.extract_strided_slice %170 {offsets = [0, 128], sizes = [8, 128], strides = [1, 1]} : vector<8x256xf32> to vector<8x128xf32>
      %c0_70 = arith.constant 0 : index
      %c0_71 = arith.constant 0 : index
      %174 = vector.load %arg15[%c0_70, %c0_71] : memref<8x128xf32, #tpu.memory_space<vmem>>, vector<8x128xf32>
      tpu.vector_store %arg15[%c0_70, %c0_71], %173 {strides = array<i32>} : memref<8x128xf32, #tpu.memory_space<vmem>>, vector<8x128xf32>,
      %c0_72 = arith.constant 0 : index
      %c0_73 = arith.constant 0 : index
      %175 = vector.load %arg1[%c0_72, %c0_73] : memref<8x16xbf16, #tpu.memory_space<vmem>>, vector<8x16xbf16>
      %c0_74 = arith.constant 0 : index
      %c0_75 = arith.constant 0 : index
      %176 = vector.load %arg6[%c0_74, %c0_75] : memref<16x512xbf16, #tpu.memory_space<vmem>>, vector<16x512xbf16>
      %cst_76 = arith.constant dense<0.000000e+00> : vector<8x512xf32>
      %177 = tpu.matmul %175, %176, %cst_76 {dimension_numbers = #tpu.dot_dimension_numbers<[1], [0], [0], [1], [0, 0, 1, 1], [], []>} : vector<8x16xbf16>, vector<16x512xbf16>, vector<8x512xf32> -> vector<8x512xf32>
      %c0_77 = arith.constant 0 : index
      %c0_78 = arith.constant 0 : index
      %178 = vector.load %arg7[%c0_77, %c0_78] : memref<1x512xf32, #tpu.memory_space<vmem>>, vector<1x512xf32>
      %179 = vector.broadcast %178 : vector<1x512xf32> to vector<8x512xf32>
      %180 = arith.addf %177, %179 : vector<8x512xf32>
      %c0_79 = arith.constant 0 : index
      %c0_80 = arith.constant 0 : index
      %181 = vector.load %arg16[%c0_79, %c0_80] : memref<8x512xf32, #tpu.memory_space<vmem>>, vector<8x512xf32>
      tpu.vector_store %arg16[%c0_79, %c0_80], %180 {strides = array<i32>} : memref<8x512xf32, #tpu.memory_space<vmem>>, vector<8x512xf32>,
    } else {
    }
    %c0 = arith.constant 0 : index
    %c0_1 = arith.constant 0 : index
    %3 = vector.load %arg2[%c0, %c0_1] : memref<32x5xbf16, #tpu.memory_space<vmem>>, vector<32x5xbf16>
    %c0_2 = arith.constant 0 : index
    %c0_3 = arith.constant 0 : index
    %4 = vector.load %arg5[%c0_2, %c0_3] : memref<5x512xbf16, #tpu.memory_space<vmem>>, vector<5x512xbf16>
    %cst = arith.constant dense<0.000000e+00> : vector<32x512xf32>
    %5 = tpu.matmul %3, %4, %cst {dimension_numbers = #tpu.dot_dimension_numbers<[1], [0], [0], [1], [0, 0, 1, 1], [], []>} : vector<32x5xbf16>, vector<5x512xbf16>, vector<32x512xf32> -> vector<32x512xf32>
    %c0_4 = arith.constant 0 : index
    %c0_5 = arith.constant 0 : index
    %6 = vector.load %arg12[%c0_4, %c0_5] : memref<32x512xf32, #tpu.memory_space<vmem>>, vector<32x512xf32>
    tpu.vector_store %arg12[%c0_4, %c0_5], %5 {strides = array<i32>} : memref<32x512xf32, #tpu.memory_space<vmem>>, vector<32x512xf32>,
    %c0_6 = arith.constant 0 : index
    %c0_7 = arith.constant 0 : index
    %7 = vector.load %arg16[%c0_6, %c0_7] : memref<8x512xf32, #tpu.memory_space<vmem>>, vector<8x512xf32>
    %c0_8 = arith.constant 0 : index
    %c0_9 = arith.constant 0 : index
    %8 = vector.load %arg14[%c0_8, %c0_9] : memref<8x128xf32, #tpu.memory_space<vmem>>, vector<8x128xf32>
    %c0_10 = arith.constant 0 : index
    %c0_11 = arith.constant 0 : index
    %9 = vector.load %arg15[%c0_10, %c0_11] : memref<8x128xf32, #tpu.memory_space<vmem>>, vector<8x128xf32>
    %c0_i32_12 = arith.constant 0 : i32
    %c8_i32 = arith.constant 8 : i32
    %10 = arith.muli %c0_i32_12, %c8_i32 : i32
    %11 = tpu.assume_multiple %10, 8 : i32
    %12 = arith.index_cast %11 : i32 to index
    %c0_13 = arith.constant 0 : index
    %13 = vector.load %arg12[%12, %c0_13] : memref<32x512xf32, #tpu.memory_space<vmem>>, vector<8x512xf32>
    %14 = arith.addf %13, %7 : vector<8x512xf32>
    %15 = arith.truncf %8 : vector<8x128xf32> to vector<8x128xbf16>
    %c0_14 = arith.constant 0 : index
    %c0_15 = arith.constant 0 : index
    %16 = vector.load %arg8[%c0_14, %c0_15] : memref<128x512xbf16, #tpu.memory_space<vmem>>, vector<128x512xbf16>
    %cst_16 = arith.constant dense<0.000000e+00> : vector<8x512xf32>
    %17 = tpu.matmul %15, %16, %cst_16 {dimension_numbers = #tpu.dot_dimension_numbers<[1], [0], [0], [1], [0, 0, 1, 1], [], []>} : vector<8x128xbf16>, vector<128x512xbf16>, vector<8x512xf32> -> vector<8x512xf32>
    %18 = arith.addf %14, %17 : vector<8x512xf32>
    %19 = vector.extract_strided_slice %18 {offsets = [0, 0], sizes = [8, 128], strides = [1, 1]} : vector<8x512xf32> to vector<8x128xf32>
    %20 = arith.negf %19 : vector<8x128xf32>
    %21 = math.exp %20 : vector<8x128xf32>
    %cst_17 = arith.constant 1.000000e+00 : f32
    %22 = vector.broadcast %cst_17 : f32 to vector<8x128xf32>
    %23 = arith.addf %22, %21 : vector<8x128xf32>
    %24 = arith.divf %22, %23 : vector<8x128xf32>
    %25 = vector.extract_strided_slice %18 {offsets = [0, 128], sizes = [8, 128], strides = [1, 1]} : vector<8x512xf32> to vector<8x128xf32>
    %26 = arith.negf %25 : vector<8x128xf32>
    %27 = math.exp %26 : vector<8x128xf32>
    %cst_18 = arith.constant 1.000000e+00 : f32
    %28 = vector.broadcast %cst_18 : f32 to vector<8x128xf32>
    %29 = arith.addf %28, %27 : vector<8x128xf32>
    %30 = arith.divf %28, %29 : vector<8x128xf32>
    %31 = vector.extract_strided_slice %18 {offsets = [0, 256], sizes = [8, 128], strides = [1, 1]} : vector<8x512xf32> to vector<8x128xf32>
    %32 = math.tanh %31 : vector<8x128xf32>
    %33 = vector.extract_strided_slice %18 {offsets = [0, 384], sizes = [8, 128], strides = [1, 1]} : vector<8x512xf32> to vector<8x128xf32>
    %34 = arith.negf %33 : vector<8x128xf32>
    %35 = math.exp %34 : vector<8x128xf32>
    %cst_19 = arith.constant 1.000000e+00 : f32
    %36 = vector.broadcast %cst_19 : f32 to vector<8x128xf32>
    %37 = arith.addf %36, %35 : vector<8x128xf32>
    %38 = arith.divf %36, %37 : vector<8x128xf32>
    %39 = arith.mulf %30, %9 : vector<8x128xf32>
    %40 = arith.mulf %24, %32 : vector<8x128xf32>
    %41 = arith.addf %39, %40 : vector<8x128xf32>
    %42 = math.tanh %41 : vector<8x128xf32>
    %43 = arith.mulf %38, %42 : vector<8x128xf32>
    %44 = arith.index_cast %11 : i32 to index
    %c0_20 = arith.constant 0 : index
    %45 = vector.load %arg13[%44, %c0_20] : memref<32x128xf32, #tpu.memory_space<vmem>>, vector<8x128xf32>
    tpu.vector_store %arg13[%44, %c0_20], %43 {strides = array<i32>} : memref<32x128xf32, #tpu.memory_space<vmem>>, vector<8x128xf32>,
    %c1_i32 = arith.constant 1 : i32
    %c8_i32_21 = arith.constant 8 : i32
    %46 = arith.muli %c1_i32, %c8_i32_21 : i32
    %47 = tpu.assume_multiple %46, 8 : i32
    %48 = arith.index_cast %47 : i32 to index
    %c0_22 = arith.constant 0 : index
    %49 = vector.load %arg12[%48, %c0_22] : memref<32x512xf32, #tpu.memory_space<vmem>>, vector<8x512xf32>
    %50 = arith.addf %49, %7 : vector<8x512xf32>
    %51 = arith.truncf %43 : vector<8x128xf32> to vector<8x128xbf16>
    %c0_23 = arith.constant 0 : index
    %c0_24 = arith.constant 0 : index
    %52 = vector.load %arg8[%c0_23, %c0_24] : memref<128x512xbf16, #tpu.memory_space<vmem>>, vector<128x512xbf16>
    %cst_25 = arith.constant dense<0.000000e+00> : vector<8x512xf32>
    %53 = tpu.matmul %51, %52, %cst_25 {dimension_numbers = #tpu.dot_dimension_numbers<[1], [0], [0], [1], [0, 0, 1, 1], [], []>} : vector<8x128xbf16>, vector<128x512xbf16>, vector<8x512xf32> -> vector<8x512xf32>
    %54 = arith.addf %50, %53 : vector<8x512xf32>
    %55 = vector.extract_strided_slice %54 {offsets = [0, 0], sizes = [8, 128], strides = [1, 1]} : vector<8x512xf32> to vector<8x128xf32>
    %56 = arith.negf %55 : vector<8x128xf32>
    %57 = math.exp %56 : vector<8x128xf32>
    %cst_26 = arith.constant 1.000000e+00 : f32
    %58 = vector.broadcast %cst_26 : f32 to vector<8x128xf32>
    %59 = arith.addf %58, %57 : vector<8x128xf32>
    %60 = arith.divf %58, %59 : vector<8x128xf32>
    %61 = vector.extract_strided_slice %54 {offsets = [0, 128], sizes = [8, 128], strides = [1, 1]} : vector<8x512xf32> to vector<8x128xf32>
    %62 = arith.negf %61 : vector<8x128xf32>
    %63 = math.exp %62 : vector<8x128xf32>
    %cst_27 = arith.constant 1.000000e+00 : f32
    %64 = vector.broadcast %cst_27 : f32 to vector<8x128xf32>
    %65 = arith.addf %64, %63 : vector<8x128xf32>
    %66 = arith.divf %64, %65 : vector<8x128xf32>
    %67 = vector.extract_strided_slice %54 {offsets = [0, 256], sizes = [8, 128], strides = [1, 1]} : vector<8x512xf32> to vector<8x128xf32>
    %68 = math.tanh %67 : vector<8x128xf32>
    %69 = vector.extract_strided_slice %54 {offsets = [0, 384], sizes = [8, 128], strides = [1, 1]} : vector<8x512xf32> to vector<8x128xf32>
    %70 = arith.negf %69 : vector<8x128xf32>
    %71 = math.exp %70 : vector<8x128xf32>
    %cst_28 = arith.constant 1.000000e+00 : f32
    %72 = vector.broadcast %cst_28 : f32 to vector<8x128xf32>
    %73 = arith.addf %72, %71 : vector<8x128xf32>
    %74 = arith.divf %72, %73 : vector<8x128xf32>
    %75 = arith.mulf %66, %41 : vector<8x128xf32>
    %76 = arith.mulf %60, %68 : vector<8x128xf32>
    %77 = arith.addf %75, %76 : vector<8x128xf32>
    %78 = math.tanh %77 : vector<8x128xf32>
    %79 = arith.mulf %74, %78 : vector<8x128xf32>
    %80 = arith.index_cast %47 : i32 to index
    %c0_29 = arith.constant 0 : index
    %81 = vector.load %arg13[%80, %c0_29] : memref<32x128xf32, #tpu.memory_space<vmem>>, vector<8x128xf32>
    tpu.vector_store %arg13[%80, %c0_29], %79 {strides = array<i32>} : memref<32x128xf32, #tpu.memory_space<vmem>>, vector<8x128xf32>,
    %c2_i32 = arith.constant 2 : i32
    %c8_i32_30 = arith.constant 8 : i32
    %82 = arith.muli %c2_i32, %c8_i32_30 : i32
    %83 = tpu.assume_multiple %82, 8 : i32
    %84 = arith.index_cast %83 : i32 to index
    %c0_31 = arith.constant 0 : index
    %85 = vector.load %arg12[%84, %c0_31] : memref<32x512xf32, #tpu.memory_space<vmem>>, vector<8x512xf32>
    %86 = arith.addf %85, %7 : vector<8x512xf32>
    %87 = arith.truncf %79 : vector<8x128xf32> to vector<8x128xbf16>
    %c0_32 = arith.constant 0 : index
    %c0_33 = arith.constant 0 : index
    %88 = vector.load %arg8[%c0_32, %c0_33] : memref<128x512xbf16, #tpu.memory_space<vmem>>, vector<128x512xbf16>
    %cst_34 = arith.constant dense<0.000000e+00> : vector<8x512xf32>
    %89 = tpu.matmul %87, %88, %cst_34 {dimension_numbers = #tpu.dot_dimension_numbers<[1], [0], [0], [1], [0, 0, 1, 1], [], []>} : vector<8x128xbf16>, vector<128x512xbf16>, vector<8x512xf32> -> vector<8x512xf32>
    %90 = arith.addf %86, %89 : vector<8x512xf32>
    %91 = vector.extract_strided_slice %90 {offsets = [0, 0], sizes = [8, 128], strides = [1, 1]} : vector<8x512xf32> to vector<8x128xf32>
    %92 = arith.negf %91 : vector<8x128xf32>
    %93 = math.exp %92 : vector<8x128xf32>
    %cst_35 = arith.constant 1.000000e+00 : f32
    %94 = vector.broadcast %cst_35 : f32 to vector<8x128xf32>
    %95 = arith.addf %94, %93 : vector<8x128xf32>
    %96 = arith.divf %94, %95 : vector<8x128xf32>
    %97 = vector.extract_strided_slice %90 {offsets = [0, 128], sizes = [8, 128], strides = [1, 1]} : vector<8x512xf32> to vector<8x128xf32>
    %98 = arith.negf %97 : vector<8x128xf32>
    %99 = math.exp %98 : vector<8x128xf32>
    %cst_36 = arith.constant 1.000000e+00 : f32
    %100 = vector.broadcast %cst_36 : f32 to vector<8x128xf32>
    %101 = arith.addf %100, %99 : vector<8x128xf32>
    %102 = arith.divf %100, %101 : vector<8x128xf32>
    %103 = vector.extract_strided_slice %90 {offsets = [0, 256], sizes = [8, 128], strides = [1, 1]} : vector<8x512xf32> to vector<8x128xf32>
    %104 = math.tanh %103 : vector<8x128xf32>
    %105 = vector.extract_strided_slice %90 {offsets = [0, 384], sizes = [8, 128], strides = [1, 1]} : vector<8x512xf32> to vector<8x128xf32>
    %106 = arith.negf %105 : vector<8x128xf32>
    %107 = math.exp %106 : vector<8x128xf32>
    %cst_37 = arith.constant 1.000000e+00 : f32
    %108 = vector.broadcast %cst_37 : f32 to vector<8x128xf32>
    %109 = arith.addf %108, %107 : vector<8x128xf32>
    %110 = arith.divf %108, %109 : vector<8x128xf32>
    %111 = arith.mulf %102, %77 : vector<8x128xf32>
    %112 = arith.mulf %96, %104 : vector<8x128xf32>
    %113 = arith.addf %111, %112 : vector<8x128xf32>
    %114 = math.tanh %113 : vector<8x128xf32>
    %115 = arith.mulf %110, %114 : vector<8x128xf32>
    %116 = arith.index_cast %83 : i32 to index
    %c0_38 = arith.constant 0 : index
    %117 = vector.load %arg13[%116, %c0_38] : memref<32x128xf32, #tpu.memory_space<vmem>>, vector<8x128xf32>
    tpu.vector_store %arg13[%116, %c0_38], %115 {strides = array<i32>} : memref<32x128xf32, #tpu.memory_space<vmem>>, vector<8x128xf32>,
    %c3_i32 = arith.constant 3 : i32
    %c8_i32_39 = arith.constant 8 : i32
    %118 = arith.muli %c3_i32, %c8_i32_39 : i32
    %119 = tpu.assume_multiple %118, 8 : i32
    %120 = arith.index_cast %119 : i32 to index
    %c0_40 = arith.constant 0 : index
    %121 = vector.load %arg12[%120, %c0_40] : memref<32x512xf32, #tpu.memory_space<vmem>>, vector<8x512xf32>
    %122 = arith.addf %121, %7 : vector<8x512xf32>
    %123 = arith.truncf %115 : vector<8x128xf32> to vector<8x128xbf16>
    %c0_41 = arith.constant 0 : index
    %c0_42 = arith.constant 0 : index
    %124 = vector.load %arg8[%c0_41, %c0_42] : memref<128x512xbf16, #tpu.memory_space<vmem>>, vector<128x512xbf16>
    %cst_43 = arith.constant dense<0.000000e+00> : vector<8x512xf32>
    %125 = tpu.matmul %123, %124, %cst_43 {dimension_numbers = #tpu.dot_dimension_numbers<[1], [0], [0], [1], [0, 0, 1, 1], [], []>} : vector<8x128xbf16>, vector<128x512xbf16>, vector<8x512xf32> -> vector<8x512xf32>
    %126 = arith.addf %122, %125 : vector<8x512xf32>
    %127 = vector.extract_strided_slice %126 {offsets = [0, 0], sizes = [8, 128], strides = [1, 1]} : vector<8x512xf32> to vector<8x128xf32>
    %128 = arith.negf %127 : vector<8x128xf32>
    %129 = math.exp %128 : vector<8x128xf32>
    %cst_44 = arith.constant 1.000000e+00 : f32
    %130 = vector.broadcast %cst_44 : f32 to vector<8x128xf32>
    %131 = arith.addf %130, %129 : vector<8x128xf32>
    %132 = arith.divf %130, %131 : vector<8x128xf32>
    %133 = vector.extract_strided_slice %126 {offsets = [0, 128], sizes = [8, 128], strides = [1, 1]} : vector<8x512xf32> to vector<8x128xf32>
    %134 = arith.negf %133 : vector<8x128xf32>
    %135 = math.exp %134 : vector<8x128xf32>
    %cst_45 = arith.constant 1.000000e+00 : f32
    %136 = vector.broadcast %cst_45 : f32 to vector<8x128xf32>
    %137 = arith.addf %136, %135 : vector<8x128xf32>
    %138 = arith.divf %136, %137 : vector<8x128xf32>
    %139 = vector.extract_strided_slice %126 {offsets = [0, 256], sizes = [8, 128], strides = [1, 1]} : vector<8x512xf32> to vector<8x128xf32>
    %140 = math.tanh %139 : vector<8x128xf32>
    %141 = vector.extract_strided_slice %126 {offsets = [0, 384], sizes = [8, 128], strides = [1, 1]} : vector<8x512xf32> to vector<8x128xf32>
    %142 = arith.negf %141 : vector<8x128xf32>
    %143 = math.exp %142 : vector<8x128xf32>
    %cst_46 = arith.constant 1.000000e+00 : f32
    %144 = vector.broadcast %cst_46 : f32 to vector<8x128xf32>
    %145 = arith.addf %144, %143 : vector<8x128xf32>
    %146 = arith.divf %144, %145 : vector<8x128xf32>
    %147 = arith.mulf %138, %113 : vector<8x128xf32>
    %148 = arith.mulf %132, %140 : vector<8x128xf32>
    %149 = arith.addf %147, %148 : vector<8x128xf32>
    %150 = math.tanh %149 : vector<8x128xf32>
    %151 = arith.mulf %146, %150 : vector<8x128xf32>
    %152 = arith.index_cast %119 : i32 to index
    %c0_47 = arith.constant 0 : index
    %153 = vector.load %arg13[%152, %c0_47] : memref<32x128xf32, #tpu.memory_space<vmem>>, vector<8x128xf32>
    tpu.vector_store %arg13[%152, %c0_47], %151 {strides = array<i32>} : memref<32x128xf32, #tpu.memory_space<vmem>>, vector<8x128xf32>,
    %c4_i32 = arith.constant 4 : i32
    %c0_48 = arith.constant 0 : index
    %c0_49 = arith.constant 0 : index
    %154 = vector.load %arg14[%c0_48, %c0_49] : memref<8x128xf32, #tpu.memory_space<vmem>>, vector<8x128xf32>
    tpu.vector_store %arg14[%c0_48, %c0_49], %151 {strides = array<i32>} : memref<8x128xf32, #tpu.memory_space<vmem>>, vector<8x128xf32>,
    %c0_50 = arith.constant 0 : index
    %c0_51 = arith.constant 0 : index
    %155 = vector.load %arg15[%c0_50, %c0_51] : memref<8x128xf32, #tpu.memory_space<vmem>>, vector<8x128xf32>
    tpu.vector_store %arg15[%c0_50, %c0_51], %149 {strides = array<i32>} : memref<8x128xf32, #tpu.memory_space<vmem>>, vector<8x128xf32>,
    %c0_52 = arith.constant 0 : index
    %c0_53 = arith.constant 0 : index
    %156 = vector.load %arg13[%c0_52, %c0_53] : memref<32x128xf32, #tpu.memory_space<vmem>>, vector<32x128xf32>
    %157 = arith.truncf %156 : vector<32x128xf32> to vector<32x128xbf16>
    %c0_54 = arith.constant 0 : index
    %c0_55 = arith.constant 0 : index
    %158 = vector.load %arg9[%c0_54, %c0_55] : memref<128x128xbf16, #tpu.memory_space<vmem>>, vector<128x128xbf16>
    %cst_56 = arith.constant dense<0.000000e+00> : vector<32x128xf32>
    %159 = tpu.matmul %157, %158, %cst_56 {dimension_numbers = #tpu.dot_dimension_numbers<[1], [0], [0], [1], [0, 0, 1, 1], [], []>} : vector<32x128xbf16>, vector<128x128xbf16>, vector<32x128xf32> -> vector<32x128xf32>
    %c0_57 = arith.constant 0 : index
    %c0_58 = arith.constant 0 : index
    %160 = vector.load %arg10[%c0_57, %c0_58] : memref<1x128xf32, #tpu.memory_space<vmem>>, vector<1x128xf32>
    %161 = vector.broadcast %160 : vector<1x128xf32> to vector<32x128xf32>
    %162 = arith.addf %159, %161 : vector<32x128xf32>
    %c0_59 = arith.constant 0 : index
    %c0_60 = arith.constant 0 : index
    %163 = vector.load %arg11[%c0_59, %c0_60] : memref<32x128xf32, #tpu.memory_space<vmem>>, vector<32x128xf32>
    tpu.vector_store %arg11[%c0_59, %c0_60], %162 {strides = array<i32>} : memref<32x128xf32, #tpu.memory_space<vmem>>, vector<32x128xf32>,
    return
  }
  func.func @transform_0(%arg0: i32) -> (i32, i32) {
    %c0_i32 = arith.constant 0 : i32
    %c0_i32_0 = arith.constant 0 : i32
    %c0_i32_1 = arith.constant 0 : i32
    return %c0_i32, %c0_i32_0 : i32, i32
  }
  func.func @transform_1(%arg0: i32) -> (i32, i32) {
    %c0_i32 = arith.constant 0 : i32
    %c0_i32_0 = arith.constant 0 : i32
    return %arg0, %c0_i32 : i32, i32
  }
  func.func @transform_2(%arg0: i32) -> (i32, i32) {
    %c0_i32 = arith.constant 0 : i32
    %c0_i32_0 = arith.constant 0 : i32
    %c0_i32_1 = arith.constant 0 : i32
    return %c0_i32, %c0_i32_0 : i32, i32
  }
  func.func @transform_3(%arg0: i32) -> (i32, i32) {
    %c0_i32 = arith.constant 0 : i32
    %c0_i32_0 = arith.constant 0 : i32
    %c0_i32_1 = arith.constant 0 : i32
    return %c0_i32, %c0_i32_0 : i32, i32
  }
  func.func @transform_4(%arg0: i32) -> (i32, i32) {
    %c0_i32 = arith.constant 0 : i32
    %c0_i32_0 = arith.constant 0 : i32
    %c0_i32_1 = arith.constant 0 : i32
    return %c0_i32, %c0_i32_0 : i32, i32
  }
  func.func @transform_5(%arg0: i32) -> (i32, i32) {
    %c0_i32 = arith.constant 0 : i32
    %c0_i32_0 = arith.constant 0 : i32
    %c0_i32_1 = arith.constant 0 : i32
    return %c0_i32, %c0_i32_0 : i32, i32
  }
  func.func @transform_6(%arg0: i32) -> (i32, i32) {
    %c0_i32 = arith.constant 0 : i32
    %c0_i32_0 = arith.constant 0 : i32
    %c0_i32_1 = arith.constant 0 : i32
    return %c0_i32, %c0_i32_0 : i32, i32
  }
  func.func @transform_7(%arg0: i32) -> (i32, i32) {
    %c0_i32 = arith.constant 0 : i32
    %c0_i32_0 = arith.constant 0 : i32
    %c0_i32_1 = arith.constant 0 : i32
    return %c0_i32, %c0_i32_0 : i32, i32
  }
  func.func @transform_8(%arg0: i32) -> (i32, i32) {
    %c0_i32 = arith.constant 0 : i32
    %c0_i32_0 = arith.constant 0 : i32
    %c0_i32_1 = arith.constant 0 : i32
    return %c0_i32, %c0_i32_0 : i32, i32
  }
  func.func @transform_9(%arg0: i32) -> (i32, i32) {
    %c0_i32 = arith.constant 0 : i32
    %c0_i32_0 = arith.constant 0 : i32
    %c0_i32_1 = arith.constant 0 : i32
    return %c0_i32, %c0_i32_0 : i32, i32
  }
  func.func @transform_10(%arg0: i32) -> (i32, i32) {
    %c0_i32 = arith.constant 0 : i32
    %c0_i32_0 = arith.constant 0 : i32
    return %arg0, %c0_i32 : i32, i32
  }
}

</mosaic_0001>

<bundles_post_ra>
// kernel: _lambda_.1
= control target key start
LH: loop header
LB: loop body
LE: loop exit
PB: predicated region body
PF: predicated region fallthrough
CT: control target
= control target key end

     0   :  { %s2635_s13 = smov 0   ;;  %s3092_s0 = inlined_call_operand.vmem [shape: bf16[8,16], index: 0, kind: input, shape index: {}]   ;;  %s3093_s1 = inlined_call_operand.vmem [shape: bf16[64,5], index: 1, kind: input, shape index: {}]   ;;  %s3094_s2 = inlined_call_operand.vmem [shape: bf16[16,256], index: 2, kind: input, shape index: {}]   ;;  %s3095_s3 = inlined_call_operand.vmem [shape: f32[1,256], index: 3, kind: input, shape index: {}]   ;;  %s3096_s4 = inlined_call_operand.vmem [shape: bf16[5,512], index: 4, kind: input, shape index: {}]   ;;  %s3097_s5 = inlined_call_operand.vmem [shape: bf16[16,512], index: 5, kind: input, shape index: {}]   ;;  %s3098_s6 = inlined_call_operand.vmem [shape: f32[1,512], index: 6, kind: input, shape index: {}]   ;;  %s3099_s7 = inlined_call_operand.vmem [shape: bf16[128,512], index: 7, kind: input, shape index: {}]   ;;  %s3100_s8 = inlined_call_operand.vmem [shape: bf16[128,128], index: 8, kind: input, shape index: {}]   ;;  %s3101_s9 = inlined_call_operand.vmem [shape: f32[1,128], index: 9, kind: input, shape index: {}]   ;;  %s3102_s10 = inlined_call_operand.vmem [shape: f32[64,128], index: 10, kind: output, shape index: {}]  }
   0x1 LB: > { %s2209_s14 = sadd.s32 4294967295, %s2575_s13   ;;  %p2213_p0 = scmp.ge.s32.totalorder %s2575_s13, 1  ;;  %s2575_s13 = sphi %s2635_s13, %s20_s13  }
   0x2   : > { %p313_p1 = scmp.lt.s32.totalorder %s2575_s13, 3 }
   0x4   : > { %p314_p2 = pnand %p2213_p0, %p313_p1 }
   0x6   : > { %317 = sbr.rel (%p314_p2) target bundleno = 1482 (0x5ca), region = 60 }
   0xb   : > { %s2214_s15 = sshll.u32 %s2209_s14, 2  ;;  %p2218_p4 = scmp.ne.s32.totalorder %s2209_s14, 0 }
   0xc   : > { %p352_p3 = scmp.lt.s32.totalorder %s2214_s15, 7 }
   0xd   : > { %367 = sbr.rel (%p2218_p4) target bundleno = 236 (0xec), region = 64 }
   0xe   : > { %s3111_s15 = smov (!%p352_p3, %s2214_s15), 7 }
   0xf   : > { %s2215_s16 = sshll.u32 %s3111_s15, 2  ;;  %s2217_s17 = sshll.u32 %s3111_s15, 3 }
  0x10   : > { %s2646_s20 = scalar_lea.vmem %s3093_s1, %s2215_s16  ;;  %s2651_s23 = scalar_lea.vmem %s3102_s10, %s2217_s17 }
  0x12   : > { %v2430_v0 = vld [vmem:[%s3094_s2 + $0x4] ss:$8 sps:$4 sm:$0xff]   ;;  %v2432_v1 = vld [vmem:[%s3094_s2] ss:$8 sps:$4 sm:$0xff]   ;;  %v2577_v2 = vmov 0   ;;  %vm393_vm0 = vcmask 130048   ;;  %v373_v9 = vlaneseq }
  0x13   : > { %429 = vmatprep.mubr.bf16.mxu0 %v2577_v2  ;;  %v368_v3 = vld [vmem:[%s3092_s0] sm:$0xf]  ;;  %524 = vmatprep.mubr.bf16.mxu1 %v2577_v2  ;;  %v2433_v4 = vld [vmem:[%s3097_s5 + $0x4] ss:$16 sps:$4 sm:$0xff]   ;;  %v2436_v6 = vld [vmem:[%s3097_s5 + $0x8] ss:$16 sps:$4 sm:$0xff]  }
  0x14   : > { %411 = vmatprep.subr.bf16.mxu0 %v2430_v0  ;;  %v2435_v5 = vld [vmem:[%s3097_s5] ss:$16 sps:$4 sm:$0xff]   ;;  %506 = vmatprep.subr.bf16.mxu1 %v2433_v4  ;;  %v2438_v7 = vld [vmem:[%s3097_s5 + $0xc] ss:$16 sps:$4 sm:$0xff]   ;;  %v374_v10 = vshrl.u32 %v373_v9, 7 }
  0x15   : > { %412 = vmatpush1.bf16.msra.mxu0 %v2432_v1  ;;  %507 = vmatpush1.bf16.msra.mxu1 %v2435_v5  ;;  %v442_v8 = vld [vmem:[%s3092_s0] sm:$0xf] }
  0x16   : > { %547 = vmatprep.subr.bf16.mxu0 %v2438_v7  ;;  %v375_v11 = vsub.s32 0, %v374_v10  ;;  %v371_v12 = vld [vmem:[%s3095_s3] sm:$0x3]  ;;  %v379_v13 = vsub.s32 1, %v374_v10  ;;  %v459_v20 = vsub.s32 2, %v374_v10  ;;  %v463_v26 = vsub.s32 3, %v374_v10 }
  0x17   : > { %v447_v14 = vld [vmem:[%s3098_s6] sm:$0xf] }
  0x18   : > { %2221 = vmatmul.mubr.msk.bf16.vlgmr.msra.gmra.mxu0 %vm393_vm0, %v368_v3  ;;  %2226 = vmatmul.mubr.msk.bf16.vlgmr.msra.gmra.mxu1 %vm393_vm0, %v442_v8  ;;  %v376_v15 = vrot.slane %v371_v12, %v375_v11  ;;  %v380_v16 = vrot.slane %v371_v12, %v379_v13  ;;  %v452_v17 = vrot.slane %v447_v14, %v375_v11 }
  0x19   : > { %548 = vmatpush1.bf16.msra.mxu0 %v2436_v6  ;;  %565 = vmatprep.mubr.bf16.mxu0 %v2577_v2  ;;  %v456_v21 = vrot.slane %v447_v14, %v379_v13  ;;  %v460_v29 = vrot.slane %v447_v14, %v459_v20  ;;  %v464_v33 = vrot.slane %v447_v14, %v463_v26 }
  0x20   : > { %2227 = vmatmul.mubr.msk.bf16.vlgmr.msra.gmra.mxu0 %vm393_vm0, %v442_v8 }
  0xd8   : > { %v431_v18 = vpop.f32.mrf.mxu0  ;;  %v526_v23 = vpop.f32.mrf.mxu1 }
  0xd9   : > { %v432_v19 = vadd.f32 %v431_v18, %v376_v15  ;;  %v527_v25 = vadd.f32 %v526_v23, %v452_v17 }
  0xda   : > { %v433_v22 = vpop.f32.mrf.mxu0  ;;  %v528_v28 = vpop.f32.mrf.mxu1 }
  0xdb   : > { %2439 = vtanh.f32 %v432_v19  ;;  %v434_v24 = vadd.f32 %v433_v22, %v380_v16  ;;  %574 = vst [vmem:[#allocation6 + $0x10] sm:$0xff] %v527_v25  ;;  %v529_v30 = vadd.f32 %v528_v28, %v456_v21 }
  0xdc   : > { %v435_v27 = vpop.f32.mrf.mxu0  ;;  %v530_v32 = vpop.f32.mrf.mxu1 }
  0xdd   : > { %2441 = vtanh.f32 %v434_v24  ;;  %575 = vst [vmem:[#allocation6] sm:$0xff] %v529_v30 }
  0xde   : > { %v436_v31 = vpop.f32.mrf.mxu0  ;;  %v531_v35 = vpop.f32.mrf.mxu1 }
  0xe0   : > { %v567_v34 = vpop.f32.mrf.mxu0 }
  0xe1   : > { %v568_v36 = vadd.f32 %v567_v34, %v460_v29 }
  0xe2   : > { %v569_v37 = vpop.f32.mrf.mxu0 }
  0xe3   : > { %576 = vst [vmem:[#allocation6 + $0x18] sm:$0xff] %v568_v36  ;;  %v570_v38 = vadd.f32 %v569_v37, %v464_v33 }
  0xe4   : > { %v571_v39 = vpop.f32.mrf.mxu0 }
  0xe5   : > { %577 = vst [vmem:[#allocation6 + $0x8] sm:$0xff] %v570_v38 }
  0xe6   : > { %v572_v40 = vpop.f32.mrf.mxu0 }
  0xe8   : > { %v2440_v41 = vpop.eup %2439 }
  0xe9   : > { %440 = vst [vmem:[#allocation4] sm:$0xff] %v2440_v41 }
  0xea   : > { %v2442_v42 = vpop.eup %2441 }
  0xeb   : > { %441 = vst [vmem:[#allocation5] sm:$0xff] %v2442_v42 }
  0xec PF: > { %v2686_v43 = vld [vmem:[%s3099_s7 + $0xe4] ss:$16 sps:$4 sm:$0xff]   ;;  %vm611_vm1 = vcmask 1041408   ;;  %vm612_vm2 = vcmask 1042432   ;;  %v2691_v44 = vld [vmem:[%s3099_s7 + $0xe0] ss:$16 sps:$4 sm:$0xff]  }
  0xed   : > { %v582_v45 = vld [vmem:[%s3096_s4] sm:$0x77]  ;;  %959 = vmatprep.subr.bf16.mxu0 %v2686_v43  ;;  %v2578_v47 = vmov 65535   ;;  %v3103_v52 = vmov 0   ;;  %v583_v56 = vld [vmem:[%s3096_s4 + $0x8] sm:$0x77] }
  0xee   : > { %v2231_v46 = vcombine.high %v582_v45, %v582_v45  ;;  %v613_v48 = vsel %vm611_vm1, 4294967295, %v2578_v47  ;;  %v2230_v49 = vcombine.low %v582_v45, %v582_v45  ;;  %v2700_v50 = vld [vmem:[%s3099_s7 + $0xc4] ss:$16 sps:$4 sm:$0xff]   ;;  %960 = vmatpush1.bf16.msra.mxu0 %v2691_v44  ;;  %659 = vmatprep.mubr.bf16.mxu1 %v3103_v52  ;;  %v2707_v53 = vld [vmem:[%s3099_s7 + $0xc0] ss:$16 sps:$4 sm:$0xff]   ;;  %v2232_v57 = vcombine.low %v583_v56, %v583_v56  ;;  %v2460_v4 = vld [vmem:[%s2646_s20 + $0x8] sm:$0xff]  }
  0xef   : > { %v614_v51 = vsel %vm612_vm2, %v613_v48, 0  ;;  %961 = vmatprep.subr.bf16.mxu0 %v2700_v50  ;;  %991 = vmatprep.mubr.bf16.mxu0 %v3103_v52  ;;  %v2233_v58 = vcombine.high %v583_v56, %v583_v56  ;;  %v2717_v59 = vld [vmem:[%s3099_s7 + $0xa4] ss:$16 sps:$4 sm:$0xff]   ;;  %vm604_vm3 = vcmask 39936   ;;  %v2724_v63 = vld [vmem:[%s3099_s7 + $0xa0] ss:$16 sps:$4 sm:$0xff]  }
  0xf0   : > { %v619_v54 = vand.u32 %v2231_v46, %v614_v51  ;;  %v616_v55 = vand.u32 %v2230_v49, %v614_v51  ;;  %v2451_v60 = vld [vmem:[%s2646_s20] sm:$0xff]   ;;  %v622_v62 = vand.u32 %v2232_v57, %v614_v51  ;;  %v2749_v3 = vld [vmem:[%s3099_s7 + $0xec] ss:$16 sps:$4 sm:$0xff]   ;;  %v2782_v9 = vld [vmem:[%s3099_s7 + $0xe8] ss:$16 sps:$4 sm:$0xff]  }
  0xf1   : > { %v625_v61 = vand.u32 %v2233_v58, %v614_v51  ;;  %v2730_v0 = vld [vmem:[%s3099_s7 + $0x84] ss:$16 sps:$4 sm:$0xff]   ;;  %v2736_v1 = vld [vmem:[%s3099_s7 + $0x80] ss:$16 sps:$4 sm:$0xff]   ;;  %v2794_v11 = vld [vmem:[%s3099_s7 + $0xcc] ss:$16 sps:$4 sm:$0xff]  }
  0xf2   : > { %641 = vmatprep.subr.bf16.mxu1 %v619_v54  ;;  %962 = vmatpush1.bf16.msra.mxu0 %v2707_v53  ;;  %v2742_v2 = vld [vmem:[%s3099_s7 + $0x64] ss:$16 sps:$4 sm:$0xff]   ;;  %v2757_v5 = vld [vmem:[%s3099_s7 + $0x60] ss:$16 sps:$4 sm:$0xff]   ;;  %v2804_v13 = vld [vmem:[%s3099_s7 + $0xc8] ss:$16 sps:$4 sm:$0xff]  }
  0xf3   : > { %642 = vmatpush1.bf16.msra.mxu1 %v616_v55  ;;  %963 = vmatprep.subr.bf16.mxu0 %v2717_v59  ;;  %v2763_v6 = vld [vmem:[%s3099_s7 + $0x44] ss:$16 sps:$4 sm:$0xff]   ;;  %v2771_v7 = vld [vmem:[%s3099_s7 + $0x40] ss:$16 sps:$4 sm:$0xff]   ;;  %v2815_v16 = vld [vmem:[%s3099_s7 + $0xac] ss:$16 sps:$4 sm:$0xff]  }
  0xf4   : > { %694 = vmatprep.subr.bf16.mxu1 %v625_v61  ;;  %v2777_v8 = vld [vmem:[%s3099_s7 + $0x24] ss:$16 sps:$4 sm:$0xff]   ;;  %v2788_v10 = vld [vmem:[%s3099_s7 + $0x20] ss:$16 sps:$4 sm:$0xff]   ;;  %v2827_v18 = vld [vmem:[%s3099_s7 + $0xa8] ss:$16 sps:$4 sm:$0xff]  }
  0xf5   : > { %v2799_v12 = vld [vmem:[%s3099_s7 + $0x4] ss:$16 sps:$4 sm:$0xff]   ;;  %v2809_v14 = vld [vmem:[%s3099_s7] ss:$16 sps:$4 sm:$0xff]   ;;  %v2833_v19 = vld [vmem:[%s3099_s7 + $0x8c] ss:$16 sps:$4 sm:$0xff]  }
  0xf6   : > { %2234 = vmatmul.mubr.msk.bf16.vlgmr.msra.gmra.mxu1 %vm604_vm3, %v2451_v60  ;;  %964 = vmatpush1.bf16.msra.mxu0 %v2724_v63  ;;  %v753_v15 = vld [vmem:[#allocation4] sm:$0xff]  ;;  %v2841_v20 = vld [vmem:[%s3099_s7 + $0x88] ss:$16 sps:$4 sm:$0xff]   ;;  %v2848_v21 = vld [vmem:[%s3099_s7 + $0x6c] ss:$16 sps:$4 sm:$0xff]  }
  0xf7   : > { %695 = vmatpush1.bf16.msra.mxu1 %v622_v62  ;;  %965 = vmatprep.subr.bf16.mxu0 %v2730_v0  ;;  %v766_v17 = vpack.c.bf16 %v753_v15, %v753_v15  ;;  %v2857_v22 = vld [vmem:[%s3099_s7 + $0x68] ss:$16 sps:$4 sm:$0xff]   ;;  %v2863_v23 = vld [vmem:[%s3099_s7 + $0x4c] ss:$16 sps:$4 sm:$0xff]   ;;  %v749_v31 = vld [vmem:[#allocation6 + $0x10] sm:$0xff] }
  0xf8   : > { %669 = vmatprep.mubr.bf16.mxu1 %v3103_v52  ;;  %1000 = vmatprep.subr.bf16.mxu1 %v2749_v3  ;;  %v2871_v24 = vld [vmem:[%s3099_s7 + $0x48] ss:$16 sps:$4 sm:$0xff]   ;;  %v2877_v25 = vld [vmem:[%s3099_s7 + $0x2c] ss:$16 sps:$4 sm:$0xff]   ;;  %v750_v34 = vld [vmem:[#allocation6] sm:$0xff] }
  0xf9   : > { %v2885_v26 = vld [vmem:[%s3099_s7 + $0x28] ss:$16 sps:$4 sm:$0xff]   ;;  %v2891_v27 = vld [vmem:[%s3099_s7 + $0xc] ss:$16 sps:$4 sm:$0xff]  }
  0xfa   : > { %966 = vmatpush1.bf16.msra.mxu0 %v2736_v1  ;;  %v2899_v28 = vld [vmem:[%s3099_s7 + $0x8] ss:$16 sps:$4 sm:$0xff]  }
  0xfb   : > { %967 = vmatprep.subr.bf16.mxu0 %v2742_v2  ;;  %v751_v49 = vld [vmem:[#allocation6 + $0x18] sm:$0xff]  ;;  %v752_v55 = vld [vmem:[#allocation6 + $0x8] sm:$0xff] }
  0xfe   : > { %2235 = vmatmul.mubr.msk.bf16.gmra.mxu1 %vm604_vm3, %v2460_v4  ;;  %968 = vmatpush1.bf16.msra.mxu0 %v2757_v5 }
  0xff   : > { %712 = vmatprep.mubr.bf16.mxu1 %v3103_v52  ;;  %969 = vmatprep.subr.bf16.mxu0 %v2763_v6 }
 0x102   : > { %970 = vmatpush1.bf16.msra.mxu0 %v2771_v7 }
 0x103   : > { %971 = vmatprep.subr.bf16.mxu0 %v2777_v8 }
 0x106   : > { %2236 = vmatmul.mubr.msk.bf16.vlgmr.msra.gmra.mxu1 %vm604_vm3, %v2451_v60  ;;  %972 = vmatpush1.bf16.msra.mxu0 %v2788_v10 }
 0x107   : > { %1001 = vmatpush1.bf16.msra.mxu1 %v2782_v9  ;;  %973 = vmatprep.subr.bf16.mxu0 %v2799_v12 }
 0x108   : > { %1002 = vmatprep.subr.bf16.mxu1 %v2794_v11  ;;  %722 = vmatprep.mubr.bf16.mxu1 %v3103_v52 }
 0x10a   : > { %974 = vmatpush1.bf16.msra.mxu0 %v2809_v14 }
 0x10b   : > { %1003 = vmatpush1.bf16.msra.mxu1 %v2804_v13  ;;  %1274 = vmatprep.subr.bf16.mxu0 %v2686_v43 }
 0x10c   : > { %1004 = vmatprep.subr.bf16.mxu1 %v2815_v16 }
 0x10d   : > { %992 = vmatmul.mubr.bf16.vlgmr.msra.gmra.mxu0 %v766_v17 }
 0x10e   : > { %2237 = vmatmul.mubr.msk.bf16.gmra.mxu1 %vm604_vm3, %v2460_v4  ;;  %1275 = vmatpush1.bf16.msra.mxu0 %v2691_v44 }
 0x10f   : > { %1005 = vmatpush1.bf16.msra.mxu1 %v2827_v18  ;;  %1032 = vmatprep.mubr.bf16.mxu1 %v3103_v52 }
 0x110   : > { %1006 = vmatprep.subr.bf16.mxu1 %v2833_v19  ;;  %1276 = vmatprep.subr.bf16.mxu0 %v2700_v50 }
 0x111   : > { %1306 = vmatprep.mubr.bf16.mxu0 %v3103_v52 }
 0x112   : > { %1277 = vmatpush1.bf16.msra.mxu0 %v2707_v53 }
 0x113   : > { %1007 = vmatpush1.bf16.msra.mxu1 %v2841_v20  ;;  %1278 = vmatprep.subr.bf16.mxu0 %v2717_v59 }
 0x114   : > { %1008 = vmatprep.subr.bf16.mxu1 %v2848_v21 }
 0x116   : > { %1279 = vmatpush1.bf16.msra.mxu0 %v2724_v63 }
 0x117   : > { %1009 = vmatpush1.bf16.msra.mxu1 %v2857_v22  ;;  %1280 = vmatprep.subr.bf16.mxu0 %v2730_v0 }
 0x118   : > { %1010 = vmatprep.subr.bf16.mxu1 %v2863_v23 }
 0x11a   : > { %1281 = vmatpush1.bf16.msra.mxu0 %v2736_v1 }
 0x11b   : > { %1011 = vmatpush1.bf16.msra.mxu1 %v2871_v24  ;;  %1282 = vmatprep.subr.bf16.mxu0 %v2742_v2 }
 0x11c   : > { %1012 = vmatprep.subr.bf16.mxu1 %v2877_v25 }
 0x11e   : > { %1283 = vmatpush1.bf16.msra.mxu0 %v2757_v5 }
 0x11f   : > { %1013 = vmatpush1.bf16.msra.mxu1 %v2885_v26  ;;  %1284 = vmatprep.subr.bf16.mxu0 %v2763_v6 }
 0x120   : > { %1014 = vmatprep.subr.bf16.mxu1 %v2891_v27 }
 0x122   : > { %1285 = vmatpush1.bf16.msra.mxu0 %v2771_v7 }
 0x123   : > { %1015 = vmatpush1.bf16.msra.mxu1 %v2899_v28  ;;  %1286 = vmatprep.subr.bf16.mxu0 %v2777_v8 }
 0x124   : > { %1315 = vmatprep.subr.bf16.mxu1 %v2749_v3 }
 0x126   : > { %1033 = vmatmul.mubr.bf16.vlgmr.msra.gmra.mxu1 %v766_v17  ;;  %1287 = vmatpush1.bf16.msra.mxu0 %v2788_v10 }
 0x127   : > { %1316 = vmatpush1.bf16.msra.mxu1 %v2782_v9  ;;  %1347 = vmatprep.mubr.bf16.mxu1 %v3103_v52 }
 0x128   : > { %1317 = vmatprep.subr.bf16.mxu1 %v2794_v11  ;;  %1288 = vmatprep.subr.bf16.mxu0 %v2799_v12 }
 0x12a   : > { %1289 = vmatpush1.bf16.msra.mxu0 %v2809_v14 }
 0x12b   : > { %1318 = vmatpush1.bf16.msra.mxu1 %v2804_v13  ;;  %1590 = vmatprep.subr.bf16.mxu0 %v2686_v43 }
 0x12c   : > { %1319 = vmatprep.subr.bf16.mxu1 %v2815_v16 }
 0x12f   : > { %1320 = vmatpush1.bf16.msra.mxu1 %v2827_v18 }
 0x130   : > { %1321 = vmatprep.subr.bf16.mxu1 %v2833_v19 }
 0x133   : > { %1322 = vmatpush1.bf16.msra.mxu1 %v2841_v20 }
 0x134   : > { %1323 = vmatprep.subr.bf16.mxu1 %v2848_v21 }
 0x137   : > { %1324 = vmatpush1.bf16.msra.mxu1 %v2857_v22 }
 0x138   : > { %1325 = vmatprep.subr.bf16.mxu1 %v2863_v23 }
 0x13b   : > { %1326 = vmatpush1.bf16.msra.mxu1 %v2871_v24 }
 0x13c   : > { %1327 = vmatprep.subr.bf16.mxu1 %v2877_v25 }
 0x13f   : > { %1328 = vmatpush1.bf16.msra.mxu1 %v2885_v26 }
 0x140   : > { %1329 = vmatprep.subr.bf16.mxu1 %v2891_v27 }
 0x143   : > { %1330 = vmatpush1.bf16.msra.mxu1 %v2899_v28 }
 0x144   : > { %1631 = vmatprep.subr.bf16.mxu1 %v2749_v3 }
 0x1b6   : > { %v661_v29 = vpop.f32.mrf.mxu1 }
 0x1b7   : > { %v762_v57 = vadd.f32 %v749_v31, %v661_v29 }
 0x1b8   : > { %v663_v30 = vpop.f32.mrf.mxu1 }
 0x1b9   : > { %v763_v62 = vadd.f32 %v750_v34, %v663_v30 }
 0x1ba   : > { %v665_v32 = vpop.f32.mrf.mxu1 }
 0x1bb   : > { %v2929_v33 = vadd.f32 %v749_v31, %v665_v32 }
 0x1bc   : > { %v667_v35 = vpop.f32.mrf.mxu1 }
 0x1bd   : > { %v2931_v36 = vadd.f32 %v750_v34, %v667_v35 }
 0x1be   : > { %v671_v37 = vpop.f32.mrf.mxu1 }
 0x1bf   : > { %v2933_v38 = vadd.f32 %v749_v31, %v671_v37 }
 0x1c0   : > { %v673_v39 = vpop.f32.mrf.mxu1 }
 0x1c1   : > { %v2935_v40 = vadd.f32 %v750_v34, %v673_v39 }
 0x1c2   : > { %v675_v41 = vpop.f32.mrf.mxu1 }
 0x1c3   : > { %v2937_v42 = vadd.f32 %v749_v31, %v675_v41 }
 0x1c4   : > { %v677_v45 = vpop.f32.mrf.mxu1 }
 0x1c5   : > { %v2939_v46 = vadd.f32 %v750_v34, %v677_v45 }
 0x1c6   : > { %v714_v47 = vpop.f32.mrf.mxu1 }
 0x1c8   : > { %v716_v48 = vpop.f32.mrf.mxu1 }
 0x1ca   : > { %v718_v51 = vpop.f32.mrf.mxu1 }
 0x1cb   : > { %v2941_v54 = vadd.f32 %v751_v49, %v718_v51 }
 0x1cc   : > { %v720_v56 = vpop.f32.mrf.mxu1 }
 0x1cd   : > { %v2943_v58 = vadd.f32 %v752_v55, %v720_v56  ;;  %v993_v60 = vpop.f32.mrf.mxu0 }
 0x1ce   : > { %v724_v61 = vpop.f32.mrf.mxu1  ;;  %v1041_v4 = vadd.f32 %v993_v60, %v762_v57 }
 0x1cf   : > { %v2945_v15 = vadd.f32 %v751_v49, %v724_v61  ;;  %v995_v17 = vpop.f32.mrf.mxu0  ;;  %v764_v61 = vadd.f32 %v751_v49, %v714_v47 }
 0x1d0   : > { %v726_v32 = vpop.f32.mrf.mxu1  ;;  %v2270_v35 = vmul.f32 -1.442695, %v1041_v4  ;;  %v1042_v37 = vadd.f32 %v995_v17, %v763_v62  ;;  %v765_v62 = vadd.f32 %v752_v55, %v716_v48 }
 0x1d1   : > { %v2947_v39 = vadd.f32 %v752_v55, %v726_v32  ;;  %v997_v41 = vpop.f32.mrf.mxu0 }
 0x1d2   : > { %v728_v45 = vpop.f32.mrf.mxu1  ;;  %v2271_v51 = vmul.f32 -1.442695, %v1042_v37  ;;  %2505 = vpow2.f32 %v2270_v35 }
 0x1d3   : > { %v2949_v52 = vadd.f32 %v751_v49, %v728_v45  ;;  %v998_v29 = vpop.f32.mrf.mxu0 }
 0x1d4   : > { %v730_v31 = vpop.f32.mrf.mxu1  ;;  %2507 = vpow2.f32 %v2271_v51  ;;  %v754_v29 = vld [vmem:[#allocation5] sm:$0xff] }
 0x1d5   : > { %3105 = vst [vmem:[#allocation7_spill] sm:$0xff] %v2949_v52  ;;  %v2951_v56 = vadd.f32 %v752_v55, %v730_v31 }
 0x1d7   : > { %3106 = vst [vmem:[#allocation8_spill] sm:$0xff] %v2951_v56 }
 0x1df   : > { %v2506_v30 = vpop.eup %2505 }
 0x1e0   : > { %v1048_v60 = vadd.f32 1.0, %v2506_v30 }
 0x1e1   : > { %v2508_v34 = vpop.eup %2507 }
 0x1e2   : > { %v1054_v57 = vadd.f32 1.0, %v2508_v34 }
 0x1e4   : > { %2509 = vrcp.f32 %v1054_v57 }
 0x1e5   : > { %2511 = vrcp.f32 %v1048_v60 }
 0x1e6   : > { %v1034_v4 = vpop.f32.mrf.mxu1 }
 0x1e7   : > { %v1043_v17 = vadd.f32 %v1034_v4, %v764_v61 }
 0x1e8   : > { %v1036_v32 = vpop.f32.mrf.mxu1 }
 0x1e9   : > { %2513 = vtanh.f32 %v1043_v17  ;;  %v1044_v37 = vadd.f32 %v1036_v32, %v765_v62 }
 0x1ea   : > { %v1038_v41 = vpop.f32.mrf.mxu1 }
 0x1eb   : > { %v2272_v35 = vmul.f32 -1.442695, %v1044_v37 }
 0x1ec   : > { %v1039_v45 = vpop.f32.mrf.mxu1 }
 0x1ed   : > { %2515 = vpow2.f32 %v2272_v35 }
 0x1f1   : > { %v2510_v51 = vpop.eup %2509 }
 0x1f2   : > { %v2512_v31 = vpop.eup %2511  ;;  %v1064_v56 = vmul.f32 %v2510_v51, %v754_v29 }
 0x1f6   : > { %v2514_v52 = vpop.eup %2513 }
 0x1f7   : > { %v1065_v34 = vmul.f32 %v2514_v52, %v2512_v31  ;;  %v3107_v52 = vmov 0  }
 0x1f9   : > { %v2953_v30 = vadd.f32 %v1065_v34, %v1064_v56 }
 0x1fa   : > { %v2516_v47 = vpop.eup %2515 }
 0x1fb   : > { %v1061_v48 = vadd.f32 1.0, %v2516_v47  ;;  %2517 = vtanh.f32 %v2953_v30 }
 0x1fd   : > { %2519 = vrcp.f32 %v1061_v48 }
 0x208   : > { %v2518_v49 = vpop.eup %2517 }
 0x20a   : > { %v2520_v55 = vpop.eup %2519 }
 0x20b   : > { %v2956_v57 = vmul.f32 %v2520_v55, %v2518_v49 }
 0x20d   : > { %v1081_v60 = vpack.c.bf16 %v2956_v57, %v2956_v57 }
 0x20f   : > { %1307 = vmatmul.mubr.bf16.vlgmr.msra.gmra.mxu0 %v1081_v60  ;;  %1348 = vmatmul.mubr.bf16.vlgmr.msra.gmra.mxu1 %v1081_v60 }
 0x210   : > { %1591 = vmatpush1.bf16.msra.mxu0 %v2691_v44  ;;  %1632 = vmatpush1.bf16.msra.mxu1 %v2782_v9 }
 0x211   : > { %1592 = vmatprep.subr.bf16.mxu0 %v2700_v50  ;;  %1633 = vmatprep.subr.bf16.mxu1 %v2794_v11 }
 0x212   : > { %1622 = vmatprep.mubr.bf16.mxu0 %v3107_v52  ;;  %1663 = vmatprep.mubr.bf16.mxu1 %v3107_v52 }
 0x214   : > { %1593 = vmatpush1.bf16.msra.mxu0 %v2707_v53  ;;  %1634 = vmatpush1.bf16.msra.mxu1 %v2804_v13 }
 0x215   : > { %1594 = vmatprep.subr.bf16.mxu0 %v2717_v59  ;;  %1635 = vmatprep.subr.bf16.mxu1 %v2815_v16 }
 0x218   : > { %1595 = vmatpush1.bf16.msra.mxu0 %v2724_v63  ;;  %1636 = vmatpush1.bf16.msra.mxu1 %v2827_v18 }
 0x219   : > { %1596 = vmatprep.subr.bf16.mxu0 %v2730_v0  ;;  %1637 = vmatprep.subr.bf16.mxu1 %v2833_v19 }
 0x21c   : > { %1597 = vmatpush1.bf16.msra.mxu0 %v2736_v1  ;;  %1638 = vmatpush1.bf16.msra.mxu1 %v2841_v20 }
 0x21d   : > { %1598 = vmatprep.subr.bf16.mxu0 %v2742_v2  ;;  %1639 = vmatprep.subr.bf16.mxu1 %v2848_v21 }
 0x220   : > { %1599 = vmatpush1.bf16.msra.mxu0 %v2757_v5  ;;  %1640 = vmatpush1.bf16.msra.mxu1 %v2857_v22 }
 0x221   : > { %1600 = vmatprep.subr.bf16.mxu0 %v2763_v6  ;;  %1641 = vmatprep.subr.bf16.mxu1 %v2863_v23 }
 0x224   : > { %1601 = vmatpush1.bf16.msra.mxu0 %v2771_v7  ;;  %1642 = vmatpush1.bf16.msra.mxu1 %v2871_v24 }
 0x225   : > { %1602 = vmatprep.subr.bf16.mxu0 %v2777_v8  ;;  %1643 = vmatprep.subr.bf16.mxu1 %v2877_v25 }
 0x228   : > { %1603 = vmatpush1.bf16.msra.mxu0 %v2788_v10  ;;  %1644 = vmatpush1.bf16.msra.mxu1 %v2885_v26 }
 0x229   : > { %1604 = vmatprep.subr.bf16.mxu0 %v2799_v12  ;;  %1645 = vmatprep.subr.bf16.mxu1 %v2891_v27 }
 0x22c   : > { %1605 = vmatpush1.bf16.msra.mxu0 %v2809_v14  ;;  %1646 = vmatpush1.bf16.msra.mxu1 %v2899_v28 }
 0x22d   : > { %1906 = vmatprep.subr.bf16.mxu0 %v2686_v43  ;;  %1947 = vmatprep.subr.bf16.mxu1 %v2749_v3 }
 0x2cf   : > { %v1308_v56 = vpop.f32.mrf.mxu0  ;;  %v1349_v61 = vpop.f32.mrf.mxu1 }
 0x2d0   : > { %v1356_v4 = vadd.f32 %v1308_v56, %v2929_v33  ;;  %v1358_v3 = vadd.f32 %v1349_v61, %v2941_v54 }
 0x2d1   : > { %v1310_v62 = vpop.f32.mrf.mxu0  ;;  %v1351_v17 = vpop.f32.mrf.mxu1 }
 0x2d2   : > { %v2305_v32 = vmul.f32 -1.442695, %v1356_v4  ;;  %v1357_v37 = vadd.f32 %v1310_v62, %v2931_v36  ;;  %v1359_v43 = vadd.f32 %v1351_v17, %v2943_v58 }
 0x2d3   : > { %v1312_v41 = vpop.f32.mrf.mxu0  ;;  %v1353_v35 = vpop.f32.mrf.mxu1 }
 0x2d4   : > { %2521 = vpow2.f32 %v2305_v32  ;;  %v2306_v45 = vmul.f32 -1.442695, %v1357_v37  ;;  %v2307_v31 = vmul.f32 -1.442695, %v1359_v43  ;;  %v2502_v37 = vld [vmem:[%s3100_s8 + $0x10] sm:$0xff]   ;;  %v2503_v41 = vld [vmem:[%s3100_s8 + $0x8] sm:$0xff]  }
 0x2d5   : > { %v1313_v51 = vpop.f32.mrf.mxu0  ;;  %v1354_v29 = vpop.f32.mrf.mxu1  ;;  %v2504_v35 = vld [vmem:[%s3100_s8] sm:$0xff]  }
 0x2d6   : > { %2523 = vpow2.f32 %v2306_v45 }
 0x2d7   : > { %2525 = vtanh.f32 %v1358_v3 }
 0x2d8   : > { %2527 = vpow2.f32 %v2307_v31 }
 0x2e1   : > { %v2522_v34 = vpop.eup %2521 }
 0x2e2   : > { %v1363_v47 = vadd.f32 1.0, %v2522_v34 }
 0x2e3   : > { %v2524_v33 = vpop.eup %2523 }
 0x2e4   : > { %2529 = vrcp.f32 %v1363_v47  ;;  %v1369_v48 = vadd.f32 1.0, %v2524_v33  ;;  %v2526_v36 = vpop.eup %2525 }
 0x2e5   : > { %v2528_v49 = vpop.eup %2527 }
 0x2e6   : > { %2531 = vrcp.f32 %v1369_v48  ;;  %v1376_v4 = vadd.f32 1.0, %v2528_v49 }
 0x2e8   : > { %2533 = vrcp.f32 %v1376_v4 }
 0x2f1   : > { %v2530_v55 = vpop.eup %2529 }
 0x2f2   : > { %v1380_v60 = vmul.f32 %v2530_v55, %v2526_v36  ;;  %v3108_v55 = vld [vmem:[#allocation8_spill] sm:$0xff] }
 0x2f3   : > { %v2532_v56 = vpop.eup %2531 }
 0x2f4   : > { %v1379_v62 = vmul.f32 %v2532_v56, %v2953_v30  ;;  %v2499_v30 = vld [vmem:[%s3100_s8 + $0x28] sm:$0xff]   ;;  %v3109_v56 = vld [vmem:[#allocation7_spill] sm:$0xff] }
 0x2f5   : > { %v2534_v54 = vpop.eup %2533 }
 0x2f6   : > { %v2999_v58 = vadd.f32 %v1380_v60, %v1379_v62 }
 0x2f8   : > { %2535 = vtanh.f32 %v2999_v58 }
 0x305   : > { %v2536_v61 = vpop.eup %2535 }
 0x306   : > { %v3002_v17 = vmul.f32 %v2536_v61, %v2534_v54 }
 0x308   : > { %v1397_v32 = vpack.c.bf16 %v3002_v17, %v3002_v17 }
 0x30a   : > { %1623 = vmatmul.mubr.bf16.vlgmr.msra.gmra.mxu0 %v1397_v32  ;;  %1664 = vmatmul.mubr.bf16.vlgmr.msra.gmra.mxu1 %v1397_v32 }
 0x30b   : > { %1907 = vmatpush1.bf16.msra.mxu0 %v2691_v44  ;;  %1948 = vmatpush1.bf16.msra.mxu1 %v2782_v9 }
 0x30c   : > { %1908 = vmatprep.subr.bf16.mxu0 %v2700_v50  ;;  %1949 = vmatprep.subr.bf16.mxu1 %v2794_v11 }
 0x30d   : > { %1938 = vmatprep.mubr.bf16.mxu0 %v3107_v52  ;;  %1979 = vmatprep.mubr.bf16.mxu1 %v3107_v52  ;;  %v2501_v52 = vld [vmem:[%s3100_s8 + $0x18] sm:$0xff]  }
 0x30f   : > { %1909 = vmatpush1.bf16.msra.mxu0 %v2707_v53  ;;  %1950 = vmatpush1.bf16.msra.mxu1 %v2804_v13 }
 0x310   : > { %1910 = vmatprep.subr.bf16.mxu0 %v2717_v59  ;;  %1951 = vmatprep.subr.bf16.mxu1 %v2815_v16 }
 0x313   : > { %1911 = vmatpush1.bf16.msra.mxu0 %v2724_v63  ;;  %1952 = vmatpush1.bf16.msra.mxu1 %v2827_v18 }
 0x314   : > { %1912 = vmatprep.subr.bf16.mxu0 %v2730_v0  ;;  %1953 = vmatprep.subr.bf16.mxu1 %v2833_v19 }
 0x317   : > { %1913 = vmatpush1.bf16.msra.mxu0 %v2736_v1  ;;  %1954 = vmatpush1.bf16.msra.mxu1 %v2841_v20 }
 0x318   : > { %1914 = vmatprep.subr.bf16.mxu0 %v2742_v2  ;;  %1955 = vmatprep.subr.bf16.mxu1 %v2848_v21 }
 0x31b   : > { %1915 = vmatpush1.bf16.msra.mxu0 %v2757_v5  ;;  %1956 = vmatpush1.bf16.msra.mxu1 %v2857_v22 }
 0x31c   : > { %1916 = vmatprep.subr.bf16.mxu0 %v2763_v6  ;;  %1957 = vmatprep.subr.bf16.mxu1 %v2863_v23 }
 0x31f   : > { %1917 = vmatpush1.bf16.msra.mxu0 %v2771_v7  ;;  %1958 = vmatpush1.bf16.msra.mxu1 %v2871_v24 }
 0x320   : > { %1918 = vmatprep.subr.bf16.mxu0 %v2777_v8  ;;  %1959 = vmatprep.subr.bf16.mxu1 %v2877_v25 }
 0x323   : > { %1919 = vmatpush1.bf16.msra.mxu0 %v2788_v10  ;;  %1960 = vmatpush1.bf16.msra.mxu1 %v2885_v26 }
 0x324   : > { %1920 = vmatprep.subr.bf16.mxu0 %v2799_v12  ;;  %1961 = vmatprep.subr.bf16.mxu1 %v2891_v27 }
 0x327   : > { %1921 = vmatpush1.bf16.msra.mxu0 %v2809_v14  ;;  %1962 = vmatpush1.bf16.msra.mxu1 %v2899_v28 }
 0x3ca   : > { %v1624_v44 = vpop.f32.mrf.mxu0  ;;  %v1665_v50 = vpop.f32.mrf.mxu1 }
 0x3cb   : > { %v1672_v53 = vadd.f32 %v1624_v44, %v2933_v38  ;;  %v1674_v10 = vadd.f32 %v1665_v50, %v2945_v15  ;;  %v2497_v15 = vld [vmem:[%s3100_s8 + $0x38] sm:$0xff]  }
 0x3cc   : > { %v1626_v59 = vpop.f32.mrf.mxu0  ;;  %v1667_v63 = vpop.f32.mrf.mxu1  ;;  %2399 = vmatprep.subr.bf16.mxu0 %v2497_v15 }
 0x3cd   : > { %v2340_v0 = vmul.f32 -1.442695, %v1672_v53  ;;  %v1673_v1 = vadd.f32 %v1626_v59, %v2935_v40  ;;  %v1675_v9 = vadd.f32 %v1667_v63, %v2947_v39  ;;  %v2024_v40 = vpack.c.bf16 %v3002_v17, %v2956_v57  ;;  %v2498_v39 = vld [vmem:[%s3100_s8 + $0x30] sm:$0xff]   ;;  %v2500_v57 = vld [vmem:[%s3100_s8 + $0x20] sm:$0xff]  }
 0x3ce   : > { %v1628_v2 = vpop.f32.mrf.mxu0  ;;  %v1669_v5 = vpop.f32.mrf.mxu1 }
 0x3cf   : > { %2537 = vpow2.f32 %v2340_v0  ;;  %v2341_v6 = vmul.f32 -1.442695, %v1673_v1  ;;  %v2342_v11 = vmul.f32 -1.442695, %v1675_v9 }
 0x3d0   : > { %v1629_v7 = vpop.f32.mrf.mxu0  ;;  %v1670_v8 = vpop.f32.mrf.mxu1 }
 0x3d1   : > { %2539 = vpow2.f32 %v2341_v6  ;;  %v2378_v7 = vld [vmem:[%s3101_s9] ss:$0 sm:$0xff] }
 0x3d2   : > { %2541 = vtanh.f32 %v1674_v10 }
 0x3d3   : > { %2543 = vpow2.f32 %v2342_v11 }
 0x3dc   : > { %v2538_v12 = vpop.eup %2537 }
 0x3dd   : > { %v1679_v13 = vadd.f32 1.0, %v2538_v12 }
 0x3de   : > { %v2540_v14 = vpop.eup %2539 }
 0x3df   : > { %2545 = vrcp.f32 %v1679_v13  ;;  %v1685_v16 = vadd.f32 1.0, %v2540_v14  ;;  %v2542_v18 = vpop.eup %2541 }
 0x3e0   : > { %v2544_v19 = vpop.eup %2543 }
 0x3e1   : > { %2547 = vrcp.f32 %v1685_v16  ;;  %v1692_v23 = vadd.f32 1.0, %v2544_v19 }
 0x3e3   : > { %2549 = vrcp.f32 %v1692_v23 }
 0x3ec   : > { %v2546_v20 = vpop.eup %2545 }
 0x3ed   : > { %v1696_v21 = vmul.f32 %v2546_v20, %v2542_v18 }
 0x3ee   : > { %v2548_v22 = vpop.eup %2547 }
 0x3ef   : > { %v1695_v24 = vmul.f32 %v2548_v22, %v2999_v58 }
 0x3f0   : > { %v2550_v26 = vpop.eup %2549 }
 0x3f1   : > { %v3043_v25 = vadd.f32 %v1696_v21, %v1695_v24 }
 0x3f3   : > { %2551 = vtanh.f32 %v3043_v25 }
 0x400   : > { %v2552_v27 = vpop.eup %2551 }
 0x401   : > { %v3046_v28 = vmul.f32 %v2552_v27, %v2550_v26 }
 0x403   : > { %v1713_v38 = vpack.c.bf16 %v3046_v28, %v3046_v28 }
 0x405   : > { %1939 = vmatmul.mubr.bf16.vlgmr.msra.gmra.mxu0 %v1713_v38  ;;  %1980 = vmatmul.mubr.bf16.vlgmr.msra.gmra.mxu1 %v1713_v38 }
 0x406   : > { %2415 = vmatprep.mubr.bf16.mxu0 %v2024_v40  ;;  %2400 = vmatpush3.bf16.msra.mxu0 %v2497_v15 }
 0x407   : > { %2401 = vmatprep.subr.bf16.mxu0 %v2498_v39 }
 0x40a   : > { %2402 = vmatpush3.bf16.msra.mxu0 %v2498_v39 }
 0x40b   : > { %2403 = vmatprep.subr.bf16.mxu0 %v2499_v30 }
 0x40e   : > { %2404 = vmatpush3.bf16.msra.mxu0 %v2499_v30 }
 0x40f   : > { %2405 = vmatprep.subr.bf16.mxu0 %v2500_v57 }
 0x412   : > { %2406 = vmatpush3.bf16.msra.mxu0 %v2500_v57 }
 0x413   : > { %2407 = vmatprep.subr.bf16.mxu0 %v2501_v52 }
 0x416   : > { %2408 = vmatpush3.bf16.msra.mxu0 %v2501_v52 }
 0x417   : > { %2409 = vmatprep.subr.bf16.mxu0 %v2502_v37 }
 0x41a   : > { %2410 = vmatpush3.bf16.msra.mxu0 %v2502_v37 }
 0x41b   : > { %2411 = vmatprep.subr.bf16.mxu0 %v2503_v41 }
 0x41e   : > { %2412 = vmatpush3.bf16.msra.mxu0 %v2503_v41 }
 0x41f   : > { %2413 = vmatprep.subr.bf16.mxu0 %v2504_v35 }
 0x422   : > { %2414 = vmatpush3.bf16.msra.mxu0 %v2504_v35 }
 0x4c5   : > { %v1940_v45 = vpop.f32.mrf.mxu0  ;;  %v1981_v51 = vpop.f32.mrf.mxu1 }
 0x4c6   : > { %v1988_v29 = vadd.f32 %v1940_v45, %v2937_v42  ;;  %v1990_v4 = vadd.f32 %v1981_v51, %v3109_v56 }
 0x4c7   : > { %v1942_v43 = vpop.f32.mrf.mxu0  ;;  %v1983_v3 = vpop.f32.mrf.mxu1 }
 0x4c8   : > { %v2375_v31 = vmul.f32 -1.442695, %v1988_v29  ;;  %v1989_v34 = vadd.f32 %v1942_v43, %v2939_v46  ;;  %v1991_v60 = vadd.f32 %v1983_v3, %v3108_v55 }
 0x4c9   : > { %v1944_v47 = vpop.f32.mrf.mxu0  ;;  %v1985_v33 = vpop.f32.mrf.mxu1 }
 0x4ca   : > { %2553 = vpow2.f32 %v2375_v31  ;;  %v2376_v48 = vmul.f32 -1.442695, %v1989_v34  ;;  %v2377_v62 = vmul.f32 -1.442695, %v1991_v60 }
 0x4cb   : > { %v1945_v36 = vpop.f32.mrf.mxu0  ;;  %v1986_v49 = vpop.f32.mrf.mxu1 }
 0x4cc   : > { %2555 = vpow2.f32 %v2376_v48 }
 0x4cd   : > { %2557 = vtanh.f32 %v1990_v4 }
 0x4ce   : > { %2559 = vpow2.f32 %v2377_v62 }
 0x4d7   : > { %v2554_v58 = vpop.eup %2553 }
 0x4d8   : > { %v1995_v54 = vadd.f32 1.0, %v2554_v58 }
 0x4d9   : > { %v2556_v42 = vpop.eup %2555 }
 0x4da   : > { %2561 = vrcp.f32 %v1995_v54  ;;  %v2001_v61 = vadd.f32 1.0, %v2556_v42  ;;  %v2558_v46 = vpop.eup %2557 }
 0x4db   : > { %v2560_v17 = vpop.eup %2559 }
 0x4dc   : > { %2563 = vrcp.f32 %v2001_v61  ;;  %v2008_v53 = vadd.f32 1.0, %v2560_v17 }
 0x4de   : > { %2565 = vrcp.f32 %v2008_v53 }
 0x4e7   : > { %v2562_v32 = vpop.eup %2561 }
 0x4e8   : > { %v2012_v44 = vmul.f32 %v2562_v32, %v2558_v46 }
 0x4e9   : > { %v2564_v50 = vpop.eup %2563 }
 0x4ea   : > { %v2011_v59 = vmul.f32 %v2564_v50, %v3043_v25 }
 0x4eb   : > { %v2566_v0 = vpop.eup %2565 }
 0x4ec   : > { %v2013_v63 = vadd.f32 %v2012_v44, %v2011_v59 }
 0x4ee   : > { %2019 = vst [vmem:[#allocation5] sm:$0xff] %v2013_v63  ;;  %2567 = vtanh.f32 %v2013_v63 }
 0x4fb   : > { %v2568_v1 = vpop.eup %2567 }
 0x4fc   : > { %v2015_v2 = vmul.f32 %v2568_v1, %v2566_v0 }
 0x4fe   : > { %2018 = vst [vmem:[#allocation4] sm:$0xff] %v2015_v2  ;;  %v2025_v5 = vpack.c.bf16 %v2015_v2, %v3046_v28 }
 0x500   : > { %2416 = vmatmul.mubr.bf16.vlgmr.msra.gmra.mxu0 %v2025_v5 }
 0x5c0   : > { %v2417_v6 = vpop.f32.mrf.mxu0 }
 0x5c1   : > { %v2140_v13 = vadd.f32 %v2417_v6, %v2378_v7 }
 0x5c2   : > { %v2131_v8 = vpop.f32.mrf.mxu0 }
 0x5c3   : > { %v2132_v9 = vadd.f32 %v2378_v7, %v2131_v8  ;;  %2148 = vst [vmem:[%s2651_s23 + $0x10] sm:$0xff] %v2140_v13 }
 0x5c4   : > { %v2418_v10 = vpop.f32.mrf.mxu0 }
 0x5c5   : > { %2146 = vst [vmem:[%s2651_s23] sm:$0xff] %v2132_v9  ;;  %v2143_v14 = vadd.f32 %v2418_v10, %v2378_v7 }
 0x5c6   : > { %v2134_v11 = vpop.f32.mrf.mxu0 }
 0x5c7   : > { %v2135_v12 = vadd.f32 %v2378_v7, %v2134_v11  ;;  %2149 = vst [vmem:[%s2651_s23 + $0x18] sm:$0xff] %v2143_v14 }
 0x5c9   : > { %2147 = vst [vmem:[%s2651_s23 + $0x8] sm:$0xff] %v2135_v12 }
 0x5ca PF: > { %s20_s13 = sadd.s32 1, %s2575_s13  }
 0x5cb   : > { %p17_p5 = scmp.ge.s32.totalorder %s20_s13, 4  }
 0x5cd   :  { %19 = sbr.rel (!%p17_p5) target bundleno = 1 (0x1), region = 101 }

</bundles_post_ra>
